<compile_context>
chip_gen: v7x
topology: tpu7x:2x2x1
jax: 0.10.0
libtpu: 0.0.40
codegen_flags: <defaults>
</compile_context>

<pallas_src>
import math
import functools

import jax
import jax.numpy as jnp
from jax.experimental import pallas as pl
from jax.experimental.pallas import tpu as pltpu


def _round_up(x, m):
    return ((x + m - 1) // m) * m


def _largest_tile(total, cap):
    """Largest multiple of 128 <= cap that divides `total` (total % 128 == 0)."""
    best = 128
    t = 128
    while t <= min(total, cap):
        if total % t == 0:
            best = t
        t += 128
    return best


# -----------------------------------------------------------------------------
# Kernel
# -----------------------------------------------------------------------------
def _eve_linear_kernel(x_ref, wa_ref, ba_ref, wb_ref, bb_ref, o_ref, h_ref, *,
                       scaling):
    # x_ref  : (TM, in_features)      compute dtype (bf16 by default)
    # wa_ref : (in_features, r_pad)   lora_A.weight.T, zero-padded cols (whole array, VMEM)
    # ba_ref : (1, r_pad)             lora_A.bias, f32 (whole array, VMEM)
    # wb_ref : (r_pad, TN)            lora_B.weight.T tile (unscaled)
    # bb_ref : (1, TN)                lora_B.bias * scaling tile, f32
    # o_ref  : (TM, TN)               x.dtype ("previous_dtype")
    # h_ref  : (TM, r_pad) f32 scratch, persists across the column-tile axis j.
    @pl.when(pl.program_id(1) == 0)
    def _():
        h = jnp.dot(x_ref[...], wa_ref[...], preferred_element_type=jnp.float32)
        # Scaling applied once per row tile, in f32:
        #   (s*h) @ Wb + s*bb  ==  s * (h @ Wb + bb)
        h_ref[...] = (h + ba_ref[...]) * scaling

    y = jnp.dot(h_ref[...].astype(wb_ref.dtype), wb_ref[...],
                preferred_element_type=jnp.float32)
    o_ref[...] = (y + bb_ref[...]).astype(o_ref.dtype)


# -----------------------------------------------------------------------------
# Weight preparation (hoisted: run once per weight update, not per forward)
# -----------------------------------------------------------------------------
def prepare_eve_weights(a_weight, a_bias, b_weight, b_bias, scaling,
                        *, compute_dtype=jnp.bfloat16):
    r, in_features = a_weight.shape
    out_features = b_weight.shape[0]
    w_dtype = (jnp.dtype(compute_dtype) if compute_dtype is not None
               else jnp.dtype(a_weight.dtype))

    r_pad = _round_up(max(r, 1), 128)
    n_pad = _round_up(out_features, 128)
    # TODO(synk): pad r_pad to 256 on v6e/v7x if the bundle dump shows half-width
    # MXU pushes for matmul-1 (only matters once bf16 I/O nears compute parity).

    wa = jnp.zeros((in_features, r_pad), dtype=w_dtype)
    wa = wa.at[:, :r].set(a_weight.T.astype(w_dtype))
    ba = jnp.zeros((1, r_pad), dtype=jnp.float32)
    ba = ba.at[0, :r].set(a_bias.astype(jnp.float32))

    wb = jnp.zeros((r_pad, n_pad), dtype=w_dtype)
    wb = wb.at[:r, :out_features].set(b_weight.T.astype(w_dtype))
    bb = jnp.zeros((1, n_pad), dtype=jnp.float32)
    bb = bb.at[0, :out_features].set(b_bias.astype(jnp.float32) * float(scaling))

    return dict(wa=wa, ba=ba, wb=wb, bb=bb,
                r=r, r_pad=r_pad, n_pad=n_pad,
                in_features=in_features, out_features=out_features,
                scaling=float(scaling))


def _vmem_budget_bytes():
    """Generation-aware VMEM budget, leaving headroom for compiler scratch."""
    try:
        cap = int(pltpu.get_tpu_info().vmem_capacity_bytes)
    except Exception:
        cap = 64 << 20                      # conservative fallback (v7x-sized)
    return max(int(cap * 0.85), 32 << 20)   # ~54 MiB on v7x, ~108 MiB on v5e/v6e


# -----------------------------------------------------------------------------
# Forward
# -----------------------------------------------------------------------------
def eve_linear_forward_prepared(x, prep, *, tm=512, tn_cap=1024):
    """x: (..., in_features). Returns (..., out_features) in x.dtype."""
    out_dtype = x.dtype                     # "previous_dtype" in the PyTorch module
    in_features = prep["in_features"]
    out_features = prep["out_features"]
    r_pad, n_pad = prep["r_pad"], prep["n_pad"]
    wa, ba, wb, bb = prep["wa"], prep["ba"], prep["wb"], prep["bb"]
    w_dtype = wa.dtype

    lead_shape = x.shape[:-1]
    x2d = x.reshape(-1, in_features)
    if x2d.dtype != w_dtype:
        # bf16 I/O halves HBM traffic; accumulation stays f32 inside the kernel.
        x2d = x2d.astype(w_dtype)
    m = x2d.shape[0]

    def nbytes(shape, dt):
        return int(math.prod(shape)) * jnp.dtype(dt).itemsize

    # ---- tile plan ----------------------------------------------------------
    # Row tile: no larger than needed; when possible keep >= 2 row blocks so the
    # "parallel" M axis can be sharded across both v7x TensorCores.
    tm = min(tm, _round_up(max(m, 1), 128))
    while tm > 128 and _round_up(m, tm) // tm < 2:
        tm = max(128, (tm // 2) // 128 * 128)
    tn = _largest_tile(n_pad, cap=tn_cap)

    budget = _vmem_budget_bytes()

    def footprint(tm_, tn_):
        return (2 * nbytes((tm_, in_features), w_dtype)    # x tile (double-buffered)
                + nbytes((in_features, r_pad), w_dtype)    # wa (single resident copy)
                + nbytes((1, r_pad), jnp.float32)          # ba (single resident copy)
                + 2 * nbytes((r_pad, tn_), w_dtype)        # wb tile
                + 2 * nbytes((1, tn_), jnp.float32)        # bb tile
                + 2 * nbytes((tm_, tn_), out_dtype)        # out tile
                + nbytes((tm_, r_pad), jnp.float32)        # h scratch
                + (4 << 20))                               # compiler / intermediate headroom

    # Shrink tiles until the footprint fits the generation-aware VMEM budget.
    while footprint(tm, tn) > budget and tm > 128:
        tm = max(128, (tm // 2) // 128 * 128)
    while footprint(tm, tn) > budget and tn > 128:
        tn = _largest_tile(n_pad, cap=tn - 128)
    # TODO(synk): add a K (in_features) grid axis with a reduction accumulator if
    # even (tm=128, tn=128) does not fit VMEM for extremely large in_features.

    m_pad = _round_up(max(m, 1), tm)
    if m_pad != m:
        x2d = jnp.pad(x2d, ((0, m_pad - m), (0, 0)))

    vmem_limit = int(min(max(footprint(tm, tn), 32 << 20), budget))
    grid = (m_pad // tm, n_pad // tn)

    cost = pl.CostEstimate(
        flops=2 * m_pad * in_features * r_pad + 2 * m_pad * r_pad * n_pad,
        transcendentals=0,
        bytes_accessed=(nbytes((m_pad, in_features), w_dtype)
                        + nbytes((m_pad, n_pad), out_dtype)
                        + nbytes((in_features, r_pad), w_dtype)
                        + grid[0] * nbytes((r_pad, n_pad), w_dtype)),
    )

    kernel = functools.partial(_eve_linear_kernel, scaling=prep["scaling"])

    out2d = pl.pallas_call(
        kernel,
        out_shape=jax.ShapeDtypeStruct((m_pad, n_pad), out_dtype),
        grid_spec=pltpu.PrefetchScalarGridSpec(
            num_scalar_prefetch=0,
            grid=grid,
            in_specs=[
                pl.BlockSpec((tm, in_features), lambda i, j: (i, 0)),
                # Grid-constant lora_A weight/bias: whole array resident in VMEM,
                # fetched once, single copy (no double-buffering of constants).
                pl.BlockSpec(memory_space=pltpu.MemorySpace.VMEM),
                pl.BlockSpec(memory_space=pltpu.MemorySpace.VMEM),
                pl.BlockSpec((r_pad, tn), lambda i, j: (0, j)),
                pl.BlockSpec((1, tn), lambda i, j: (0, j)),
            ],
            out_specs=pl.BlockSpec((tm, tn), lambda i, j: (i, j)),
            scratch_shapes=[pltpu.VMEM((tm, r_pad), jnp.float32)],
        ),
        compiler_params=pltpu.CompilerParams(
            # j must run in ascending order per row tile (h cache); i is sharded
            # across TensorCores (megacore) on v7x.
            dimension_semantics=("parallel", "arbitrary"),
            vmem_limit_bytes=vmem_limit,
        ),
        cost_estimate=cost,
    )(x2d, wa, ba, wb, bb)

    out2d = out2d[:m, :out_features]
    return out2d.reshape(*lead_shape, out_features)


def eve_linear_forward(x, a_weight, a_bias, b_weight, b_bias, scaling,
                       *, compute_dtype=jnp.bfloat16, tm=512, tn_cap=1024):
    """Convenience wrapper (prep + forward). For repeated calls with static
    weights, call prepare_eve_weights() once and reuse the prepared tensors."""
    prep = prepare_eve_weights(a_weight, a_bias, b_weight, b_bias, scaling,
                               compute_dtype=compute_dtype)
    return eve_linear_forward_prepared(x, prep, tm=tm, tn_cap=tn_cap)


if __name__ == "__main__":
    # Small deterministic setup consistent with EVELinear.__init__.
    batch, seq = 2, 8
    in_features, out_features = 32, 32
    r, lora_alpha = 8, 16
    scaling = lora_alpha / r
    dtype = jnp.float32

    key = jax.random.PRNGKey(0)
    kx, ka_w, ka_b, kb_w, kb_b, kb_w2, kb_b2, kx2 = jax.random.split(key, 8)

    x = jax.random.normal(kx, (batch, seq, in_features), dtype=dtype)

    # lora_A.weight: kaiming_uniform_(a=sqrt(5)) -> U(-1/sqrt(fan_in), 1/sqrt(fan_in))
    bound_a = 1.0 / math.sqrt(in_features)
    a_weight = jax.random.uniform(ka_w, (r, in_features), dtype=dtype,
                                  minval=-bound_a, maxval=bound_a)
    a_bias = jax.random.uniform(ka_b, (r,), dtype=dtype,
                                minval=-bound_a, maxval=bound_a)

    # NOTE: reset_lora_parameters() zeroes lora_B.weight; synthetic non-zero
    # values are used so the second matmul is actually exercised.
    bound_b = 1.0 / math.sqrt(r)
    b_weight = jax.random.uniform(kb_w, (out_features, r), dtype=dtype,
                                  minval=-bound_b, maxval=bound_b)
    b_bias = jax.random.uniform(kb_b, (out_features,), dtype=dtype,
                                minval=-bound_b, maxval=bound_b)

    # Pure-JAX f32 reference of the same forward pass.
    ref = (((x @ a_weight.T + a_bias) @ b_weight.T + b_bias) * scaling).astype(dtype)

    # 1) f32 compute path — matches the PyTorch f32 forward tightly.
    prep_f32 = prepare_eve_weights(a_weight, a_bias, b_weight, b_bias, scaling,
                                   compute_dtype=jnp.float32)
    out_f32 = jax.block_until_ready(eve_linear_forward_prepared(x, prep_f32))
    assert out_f32.shape == (batch, seq, out_features)
    assert out_f32.dtype == x.dtype
    assert jnp.allclose(out_f32, ref, atol=1e-5, rtol=1e-5), "f32 path mismatch"

    # 2) default bf16 compute path (HBM-bound kernel => ~2x traffic win);
    #    f32 accumulation, f32 biases/scaling, output cast back to x.dtype.
    out_bf16 = jax.block_until_ready(
        eve_linear_forward(x, a_weight, a_bias, b_weight, b_bias, scaling))
    assert out_bf16.dtype == x.dtype
    assert jnp.allclose(out_bf16, ref, atol=6e-2, rtol=6e-2), "bf16 path mismatch"

    # 3) odd row count (padding path).
    x_odd = x.reshape(-1, in_features)[:13]
    out_odd = jax.block_until_ready(eve_linear_forward_prepared(x_odd, prep_f32))
    ref_odd = (((x_odd @ a_weight.T + a_bias) @ b_weight.T + b_bias) * scaling
               ).astype(dtype)
    assert jnp.allclose(out_odd, ref_odd, atol=1e-5, rtol=1e-5), "padded-path mismatch"

    # 4) multi-tile grid: several row tiles AND several output-column tiles, so
    #    the cached intermediate h is actually reused across j > 0.
    out_features2 = 320
    b_weight2 = jax.random.uniform(kb_w2, (out_features2, r), dtype=dtype,
                                   minval=-bound_b, maxval=bound_b)
    b_bias2 = jax.random.uniform(kb_b2, (out_features2,), dtype=dtype,
                                 minval=-bound_b, maxval=bound_b)
    x2 = jax.random.normal(kx2, (300, in_features), dtype=dtype)
    prep2 = prepare_eve_weights(a_weight, a_bias, b_weight2, b_bias2, scaling,
                                compute_dtype=jnp.float32)
    out2 = jax.block_until_ready(
        eve_linear_forward_prepared(x2, prep2, tn_cap=128))
    ref2 = (((x2 @ a_weight.T + a_bias) @ b_weight2.T + b_bias2) * scaling
            ).astype(dtype)
    assert out2.shape == (300, out_features2)
    assert jnp.allclose(out2, ref2, atol=1e-5, rtol=1e-5), "multi-tile mismatch"

    print("KERNEL_OK")
</pallas_src>

<mosaic_0001>
module attributes {stable_mosaic.version = 11 : i64} {
  func.func @_eve_linear_kernel(%arg0: i32, %arg1: i32, %arg2: memref<128x32xf32, #tpu.memory_space<vmem>>, %arg3: memref<32x128xf32, #tpu.memory_space<vmem>>, %arg4: memref<1x128xf32, #tpu.memory_space<vmem>>, %arg5: memref<128x128xf32, #tpu.memory_space<vmem>>, %arg6: memref<1x128xf32, #tpu.memory_space<vmem>>, %arg7: memref<128x128xf32, #tpu.memory_space<vmem>>, %arg8: memref<128x128xf32, #tpu.memory_space<vmem>>) attributes {dimension_semantics = [#tpu.dimension_semantics<parallel>, #tpu.dimension_semantics<arbitrary>], iteration_bounds = array<i64: 1, 1>, scalar_prefetch = 0 : i64, scratch_operands = 1 : i64, tpu.core_type = #tpu.core_type<tc>, window_params = [{transform_indices = @transform_0, window_bounds = array<i64: 128, 32>}, {pipeline_mode = #tpu.pipeline_mode<synchronous>, transform_indices = @transform_1, window_bounds = array<i64: 32, 128>}, {pipeline_mode = #tpu.pipeline_mode<synchronous>, transform_indices = @transform_2, window_bounds = array<i64: 1, 128>}, {transform_indices = @transform_3, window_bounds = array<i64: 128, 128>}, {transform_indices = @transform_4, window_bounds = array<i64: 1, 128>}, {transform_indices = @transform_5, window_bounds = array<i64: 128, 128>}]} {
    %c0_i32 = arith.constant 0 : i32
    %0 = arith.cmpi eq, %arg1, %c0_i32 : i32
    %1 = arith.extui %0 : i1 to i32
    %c0_i32_0 = arith.constant 0 : i32
    %2 = arith.cmpi ne, %1, %c0_i32_0 : i32
    scf.if %2 {
      %c0_8 = arith.constant 0 : index
      %c0_9 = arith.constant 0 : index
      %10 = vector.load %arg2[%c0_8, %c0_9] : memref<128x32xf32, #tpu.memory_space<vmem>>, vector<128x32xf32>
      %c0_10 = arith.constant 0 : index
      %c0_11 = arith.constant 0 : index
      %11 = vector.load %arg3[%c0_10, %c0_11] : memref<32x128xf32, #tpu.memory_space<vmem>>, vector<32x128xf32>
      %cst_12 = arith.constant dense<0.000000e+00> : vector<128x128xf32>
      %12 = tpu.matmul %10, %11, %cst_12 {dimension_numbers = #tpu.dot_dimension_numbers<[1], [0], [0], [1], [0, 0, 1, 1], [], []>} : vector<128x32xf32>, vector<32x128xf32>, vector<128x128xf32> -> vector<128x128xf32>
      %c0_13 = arith.constant 0 : index
      %c0_14 = arith.constant 0 : index
      %13 = vector.load %arg4[%c0_13, %c0_14] : memref<1x128xf32, #tpu.memory_space<vmem>>, vector<1x128xf32>
      %14 = vector.broadcast %13 : vector<1x128xf32> to vector<128x128xf32>
      %15 = arith.addf %12, %14 : vector<128x128xf32>
      %cst_15 = arith.constant 2.000000e+00 : f32
      %16 = vector.broadcast %cst_15 : f32 to vector<128x128xf32>
      %17 = arith.mulf %15, %16 : vector<128x128xf32>
      %c0_16 = arith.constant 0 : index
      %c0_17 = arith.constant 0 : index
      %18 = vector.load %arg8[%c0_16, %c0_17] : memref<128x128xf32, #tpu.memory_space<vmem>>, vector<128x128xf32>
      tpu.vector_store %arg8[%c0_16, %c0_17], %17 {strides = array<i32>} : memref<128x128xf32, #tpu.memory_space<vmem>>, vector<128x128xf32>,
    } else {
    }
    %c0 = arith.constant 0 : index
    %c0_1 = arith.constant 0 : index
    %3 = vector.load %arg8[%c0, %c0_1] : memref<128x128xf32, #tpu.memory_space<vmem>>, vector<128x128xf32>
    %c0_2 = arith.constant 0 : index
    %c0_3 = arith.constant 0 : index
    %4 = vector.load %arg5[%c0_2, %c0_3] : memref<128x128xf32, #tpu.memory_space<vmem>>, vector<128x128xf32>
    %cst = arith.constant dense<0.000000e+00> : vector<128x128xf32>
    %5 = tpu.matmul %3, %4, %cst {dimension_numbers = #tpu.dot_dimension_numbers<[1], [0], [0], [1], [0, 0, 1, 1], [], []>} : vector<128x128xf32>, vector<128x128xf32>, vector<128x128xf32> -> vector<128x128xf32>
    %c0_4 = arith.constant 0 : index
    %c0_5 = arith.constant 0 : index
    %6 = vector.load %arg6[%c0_4, %c0_5] : memref<1x128xf32, #tpu.memory_space<vmem>>, vector<1x128xf32>
    %7 = vector.broadcast %6 : vector<1x128xf32> to vector<128x128xf32>
    %8 = arith.addf %5, %7 : vector<128x128xf32>
    %c0_6 = arith.constant 0 : index
    %c0_7 = arith.constant 0 : index
    %9 = vector.load %arg7[%c0_6, %c0_7] : memref<128x128xf32, #tpu.memory_space<vmem>>, vector<128x128xf32>
    tpu.vector_store %arg7[%c0_6, %c0_7], %8 {strides = array<i32>} : memref<128x128xf32, #tpu.memory_space<vmem>>, vector<128x128xf32>,
    return
  }
  func.func @transform_0(%arg0: i32, %arg1: i32) -> (i32, i32) {
    %c0_i32 = arith.constant 0 : i32
    %c0_i32_0 = arith.constant 0 : i32
    return %arg0, %c0_i32 : i32, i32
  }
  func.func @transform_1(%arg0: i32, %arg1: i32) -> (i32, i32) {
    %c0_i32 = arith.constant 0 : i32
    %c0_i32_0 = arith.constant 0 : i32
    %c0_i32_1 = arith.constant 0 : i32
    return %c0_i32, %c0_i32_0 : i32, i32
  }
  func.func @transform_2(%arg0: i32, %arg1: i32) -> (i32, i32) {
    %c0_i32 = arith.constant 0 : i32
    %c0_i32_0 = arith.constant 0 : i32
    %c0_i32_1 = arith.constant 0 : i32
    return %c0_i32, %c0_i32_0 : i32, i32
  }
  func.func @transform_3(%arg0: i32, %arg1: i32) -> (i32, i32) {
    %c0_i32 = arith.constant 0 : i32
    %c0_i32_0 = arith.constant 0 : i32
    return %c0_i32, %arg1 : i32, i32
  }
  func.func @transform_4(%arg0: i32, %arg1: i32) -> (i32, i32) {
    %c0_i32 = arith.constant 0 : i32
    %c0_i32_0 = arith.constant 0 : i32
    return %c0_i32, %arg1 : i32, i32
  }
  func.func @transform_5(%arg0: i32, %arg1: i32) -> (i32, i32) {
    %c0_i32 = arith.constant 0 : i32
    return %arg0, %arg1 : i32, i32
  }
}

</mosaic_0001>

<bundles_post_ra>
// kernel: tpu_custom_call.1
= control target key start
LH: loop header
LB: loop body
LE: loop exit
PB: predicated region body
PF: predicated region fallthrough
CT: control target
= control target key end

     0   :  { %vm52_vm0 = vcmask 261120   ;;  %s910_s0 = inlined_call_operand.vmem [shape: f32[128,32], index: 0, kind: input, shape index: {}]   ;;  %s911_s1 = inlined_call_operand.vmem [shape: f32[32,128], index: 1, kind: input, shape index: {}]   ;;  %s912_s2 = inlined_call_operand.vmem [shape: f32[1,128], index: 2, kind: input, shape index: {}]   ;;  %s913_s3 = inlined_call_operand.vmem [shape: f32[128,128], index: 3, kind: input, shape index: {}]   ;;  %s914_s4 = inlined_call_operand.vmem [shape: f32[1,128], index: 4, kind: input, shape index: {}]   ;;  %s915_s5 = inlined_call_operand.hbm [shape: f32[128,128], index: 5, kind: output, shape index: {}]  }
   0x1   :  { %v41_v0 = vld [vmem:[%s911_s1] sm:$0xff]  ;;  %v42_v1 = vld [vmem:[%s911_s1 + $0x8] sm:$0xff]  ;;  %v43_v2 = vld [vmem:[%s911_s1 + $0x10] sm:$0xff] }
   0x2   :  { %v652_v3 = vpack.c.bf16 %v42_v1, %v41_v0  ;;  %v44_v4 = vld [vmem:[%s911_s1 + $0x18] sm:$0xff]  ;;  %v25_v5 = vld [vmem:[%s910_s0] sm:$0xff]  ;;  %v295_v8 = vld [vmem:[%s913_s3 + $0x8] sm:$0xff] }
   0x3   :  { %v656_v6 = vpack.c.bf16 %v44_v4, %v43_v2  ;;  %572 = vmatprep.mubr.msk.f32.mxu0 %vm52_vm0, %v25_v5  ;;  %v294_v7 = vld [vmem:[%s913_s3] sm:$0xff]  ;;  %v296_v9 = vld [vmem:[%s913_s3 + $0x10] sm:$0xff]  ;;  %v297_v10 = vld [vmem:[%s913_s3 + $0x18] sm:$0xff] }
   0x4   :  { %653 = vmatprep.subr.bf16.mxu0 %v652_v3  ;;  %v26_v11 = vld [vmem:[%s910_s0 + $0x8] sm:$0xff]  ;;  %v660_v12 = vpack.c.bf16 %v295_v8, %v294_v7  ;;  %v27_v13 = vld [vmem:[%s910_s0 + $0x10] sm:$0xff]  ;;  %v664_v14 = vpack.c.bf16 %v297_v10, %v296_v9  ;;  %v298_v15 = vld [vmem:[%s913_s3 + $0x20] sm:$0xff] }
   0x5   :  { %655 = vmatpush3.bf16.msra.mxu0 %v652_v3  ;;  %v299_v16 = vld [vmem:[%s913_s3 + $0x28] sm:$0xff] }
   0x6   :  { %657 = vmatprep.subr.bf16.mxu0 %v656_v6  ;;  %692 = vmatprep.subr.bf16.mxu1 %v660_v12 }
   0x7   :  { %700 = vmatpush3.bf16.msra.mxu1 %v660_v12 }
   0x9   :  { %659 = vmatpush3.bf16.msra.mxu0 %v656_v6 }
   0xa   :  { %661 = vmatprep.subr.bf16.mxu0 %v660_v12 }
   0xc   :  { %573 = vmatmul.mubr.msk.f32.vlgmr.msra.gmra.mrb[0].mxu0 %vm52_vm0, %v26_v11 }
   0xd   :  { %10 = vsyncpa [#allocation4], 0  ;;  %575 = vmatprep.mubr.msk.f32.mxu0 %vm52_vm0, %v27_v13  ;;  %v28_v17 = vld [vmem:[%s910_s0 + $0x18] sm:$0xff]  ;;  %663 = vmatpush3.bf16.msra.mxu0 %v660_v12  ;;  %v29_v18 = vld [vmem:[%s910_s0 + $0x20] sm:$0xff]  ;;  %v668_v19 = vpack.c.bf16 %v299_v16, %v298_v15 }
   0xe   :  { %665 = vmatprep.subr.bf16.mxu0 %v664_v14  ;;  %693 = vmatprep.subr.bf16.mxu1 %v664_v14  ;;  %v300_v20 = vld [vmem:[%s913_s3 + $0x30] sm:$0xff]  ;;  %v301_v21 = vld [vmem:[%s913_s3 + $0x38] sm:$0xff]  ;;  %v30_v22 = vld [vmem:[%s910_s0 + $0x28] sm:$0xff] }
   0xf   :  { %701 = vmatpush3.bf16.msra.mxu1 %v664_v14  ;;  %v31_v23 = vld [vmem:[%s910_s0 + $0x30] sm:$0xff]  ;;  %v672_v24 = vpack.c.bf16 %v301_v21, %v300_v20  ;;  %v302_v25 = vld [vmem:[%s913_s3 + $0x40] sm:$0xff]  ;;  %v303_v26 = vld [vmem:[%s913_s3 + $0x48] sm:$0xff] }
  0x10   :  { %576 = vmatmul.mubr.msk.f32.gmra.mrb[2].mxu0 %vm52_vm0, %v28_v17  ;;  %694 = vmatprep.subr.bf16.mxu1 %v668_v19  ;;  %v32_v27 = vld [vmem:[%s910_s0 + $0x38] sm:$0xff]  ;;  %v33_v28 = vld [vmem:[%s910_s0 + $0x40] sm:$0xff]  ;;  %v676_v29 = vpack.c.bf16 %v303_v26, %v302_v25  ;;  %v304_v30 = vld [vmem:[%s913_s3 + $0x50] sm:$0xff] }
  0x11   :  { %578 = vmatprep.mubr.msk.f32.mxu0 %vm52_vm0, %v29_v18  ;;  %667 = vmatpush3.bf16.msra.mxu0 %v664_v14  ;;  %v305_v31 = vld [vmem:[%s913_s3 + $0x58] sm:$0xff]  ;;  %v34_v32 = vld [vmem:[%s910_s0 + $0x48] sm:$0xff]  ;;  %v35_v33 = vld [vmem:[%s910_s0 + $0x50] sm:$0xff] }
  0x12   :  { %669 = vmatprep.subr.bf16.mxu0 %v668_v19  ;;  %v680_v34 = vpack.c.bf16 %v305_v31, %v304_v30  ;;  %v306_v35 = vld [vmem:[%s913_s3 + $0x60] sm:$0xff]  ;;  %v307_v36 = vld [vmem:[%s913_s3 + $0x68] sm:$0xff]  ;;  %v36_v37 = vld [vmem:[%s910_s0 + $0x58] sm:$0xff] }
  0x13   :  { %702 = vmatpush3.bf16.msra.mxu1 %v668_v19  ;;  %v37_v38 = vld [vmem:[%s910_s0 + $0x60] sm:$0xff]  ;;  %v684_v39 = vpack.c.bf16 %v307_v36, %v306_v35  ;;  %v38_v40 = vld [vmem:[%s910_s0 + $0x68] sm:$0xff]  ;;  %v39_v41 = vld [vmem:[%s910_s0 + $0x70] sm:$0xff] }
  0x14   :  { %579 = vmatmul.mubr.msk.f32.gmra.mrb[4].mxu0 %vm52_vm0, %v30_v22  ;;  %695 = vmatprep.subr.bf16.mxu1 %v672_v24  ;;  %v40_v42 = vld [vmem:[%s910_s0 + $0x78] sm:$0xff]  ;;  %v308_v43 = vld [vmem:[%s913_s3 + $0x70] sm:$0xff]  ;;  %v494_v46 = vld [vmem:[%s912_s2] ss:$0 sm:$0xff] }
  0x15   :  { %581 = vmatprep.mubr.msk.f32.mxu0 %vm52_vm0, %v31_v23  ;;  %671 = vmatpush3.bf16.msra.mxu0 %v668_v19  ;;  %v309_v44 = vld [vmem:[%s913_s3 + $0x78] sm:$0xff]  ;;  %v511_v31 = vld [vmem:[%s914_s4] ss:$0 sm:$0xff]  ;;  %s735_s3 = smov [#allocation3]  }
  0x16   :  { %673 = vmatprep.subr.bf16.mxu0 %v672_v24  ;;  %v688_v45 = vpack.c.bf16 %v309_v44, %v308_v43  ;;  %s483_s4 = sshll.u32 %s735_s3, 4  ;;  %s484_s4 = int_to_ptr.vmem [resolvable:$true] %s483_s4 }
  0x17   :  { %703 = vmatpush3.bf16.msra.mxu1 %v672_v24  ;;  %s711_s14 = scalar_lea.vmem %s484_s4, 2048  ;;  %p716_p1 = scmp.lt.s32.totalorder %s484_s4, %s484_s4 }
  0x18   :  { %582 = vmatmul.mubr.msk.f32.gmra.mrb[6].mxu0 %vm52_vm0, %v32_v27  ;;  %696 = vmatprep.subr.bf16.mxu1 %v676_v29  ;;  %p712_p0 = scmp.ne.s32.totalorder %s484_s4, %s711_s14  ;;  %p717_p2 = scmp.lt.s32.totalorder %s711_s14, %s711_s14 }
  0x19   :  { %584 = vmatprep.mubr.msk.f32.mxu0 %vm52_vm0, %v33_v28  ;;  %675 = vmatpush3.bf16.msra.mxu0 %v672_v24 }
  0x1a   :  { %677 = vmatprep.subr.bf16.mxu0 %v676_v29  ;;  %p718_p3 = por %p717_p2, %p716_p1 }
  0x1b   :  { %704 = vmatpush3.bf16.msra.mxu1 %v676_v29 }
  0x1c   :  { %585 = vmatmul.mubr.msk.f32.gmra.mrb[8].mxu0 %vm52_vm0, %v34_v32  ;;  %697 = vmatprep.subr.bf16.mxu1 %v680_v34  ;;  %p719_p4 = pnand %p718_p3, %p712_p0 }
  0x1d   :  { %587 = vmatprep.mubr.msk.f32.mxu0 %vm52_vm0, %v35_v33  ;;  %679 = vmatpush3.bf16.msra.mxu0 %v676_v29 }
  0x1e   :  { %681 = vmatprep.subr.bf16.mxu0 %v680_v34 }
  0x1f   :  { %705 = vmatpush3.bf16.msra.mxu1 %v680_v34 }
  0x20   :  { %588 = vmatmul.mubr.msk.f32.gmra.mrb[10].mxu0 %vm52_vm0, %v36_v37  ;;  %698 = vmatprep.subr.bf16.mxu1 %v684_v39 }
  0x21   :  { %590 = vmatprep.mubr.msk.f32.mxu0 %vm52_vm0, %v37_v38  ;;  %683 = vmatpush3.bf16.msra.mxu0 %v680_v34 }
  0x22   :  { %685 = vmatprep.subr.bf16.mxu0 %v684_v39 }
  0x23   :  { %706 = vmatpush3.bf16.msra.mxu1 %v684_v39 }
  0x24   :  { %591 = vmatmul.mubr.msk.f32.gmra.mrb[12].mxu0 %vm52_vm0, %v38_v40  ;;  %699 = vmatprep.subr.bf16.mxu1 %v688_v45 }
  0x25   :  { %593 = vmatprep.mubr.msk.f32.mxu0 %vm52_vm0, %v39_v41  ;;  %687 = vmatpush3.bf16.msra.mxu0 %v684_v39 }
  0x26   :  { %689 = vmatprep.subr.bf16.mxu0 %v688_v45 }
  0x27   :  { %707 = vmatpush3.bf16.msra.mxu1 %v688_v45 }
  0x28   :  { %594 = vmatmul.mubr.msk.f32.gmra.mrb[14].mxu0 %vm52_vm0, %v40_v42 }
  0x29   :  { %691 = vmatpush3.bf16.msra.mxu0 %v688_v45 }
  0xdf   :  { %v574_v47 = vpop.f32.mrb[0].mxu0 }
  0xe0   :  { %v173_v48 = vadd.f32 %v574_v47, %v494_v46  ;;  %v167_v49 = vpop.f32.mrb[1].mxu0 }
  0xe1   :  { %v168_v50 = vadd.f32 %v494_v46, %v167_v49 }
  0xe2   :  { %v247_v53 = vmul.f32 2.0, %v173_v48 }
  0xe3   :  { %v246_v51 = vmul.f32 2.0, %v168_v50  ;;  %v577_v52 = vpop.f32.mrb[2].mxu0 }
  0xe4   :  { %v183_v54 = vadd.f32 %v577_v52, %v494_v46  ;;  %v177_v55 = vpop.f32.mrb[3].mxu0 }
  0xe5   :  { %v178_v56 = vadd.f32 %v494_v46, %v177_v55  ;;  %628 = vmatprep.mubr.f32.mxu0 %v246_v51 }
  0xe6   :  { %629 = vmatmul.mubr.f32.vlgmr.msra.gmra.mrb[16].mxu0 %v247_v53  ;;  %v249_v59 = vmul.f32 2.0, %v183_v54 }
  0xe7   :  { %v248_v57 = vmul.f32 2.0, %v178_v56  ;;  %v580_v58 = vpop.f32.mrb[4].mxu0 }
  0xe8   :  { %v193_v60 = vadd.f32 %v580_v58, %v494_v46  ;;  %v187_v61 = vpop.f32.mrb[5].mxu0 }
  0xe9   :  { %v188_v62 = vadd.f32 %v494_v46, %v187_v61  ;;  %631 = vmatprep.mubr.f32.mxu0 %v248_v57 }
  0xea   :  { %632 = vmatmul.mubr.f32.gmra.mrb[18].mxu0 %v249_v59  ;;  %v251_v1 = vmul.f32 2.0, %v193_v60 }
  0xeb   :  { %v250_v63 = vmul.f32 2.0, %v188_v62  ;;  %v583_v0 = vpop.f32.mrb[6].mxu0 }
  0xec   :  { %v203_v2 = vadd.f32 %v583_v0, %v494_v46  ;;  %v197_v3 = vpop.f32.mrb[7].mxu0 }
  0xed   :  { %634 = vmatprep.mubr.f32.mxu0 %v250_v63  ;;  %v198_v4 = vadd.f32 %v494_v46, %v197_v3 }
  0xee   :  { %635 = vmatmul.mubr.f32.gmra.mrb[20].mxu0 %v251_v1  ;;  %v253_v7 = vmul.f32 2.0, %v203_v2 }
  0xef   :  { %v586_v5 = vpop.f32.mrb[8].mxu0  ;;  %v252_v6 = vmul.f32 2.0, %v198_v4 }
  0xf0   :  { %v213_v8 = vadd.f32 %v586_v5, %v494_v46  ;;  %v207_v9 = vpop.f32.mrb[9].mxu0 }
  0xf1   :  { %v208_v10 = vadd.f32 %v494_v46, %v207_v9  ;;  %637 = vmatprep.mubr.f32.mxu1 %v252_v6 }
  0xf2   :  { %638 = vmatmul.mubr.f32.vlgmr.msra.gmra.mrb[0].mxu1 %v253_v7  ;;  %v255_v13 = vmul.f32 2.0, %v213_v8 }
  0xf3   :  { %v254_v11 = vmul.f32 2.0, %v208_v10  ;;  %v589_v12 = vpop.f32.mrb[10].mxu0 }
  0xf4   :  { %v223_v14 = vadd.f32 %v589_v12, %v494_v46  ;;  %v217_v15 = vpop.f32.mrb[11].mxu0 }
  0xf5   :  { %v218_v16 = vadd.f32 %v494_v46, %v217_v15  ;;  %640 = vmatprep.mubr.f32.mxu1 %v254_v11 }
  0xf6   :  { %641 = vmatmul.mubr.f32.gmra.mrb[2].mxu1 %v255_v13  ;;  %v257_v19 = vmul.f32 2.0, %v223_v14 }
  0xf7   :  { %v256_v17 = vmul.f32 2.0, %v218_v16  ;;  %v592_v18 = vpop.f32.mrb[12].mxu0 }
  0xf8   :  { %v233_v20 = vadd.f32 %v592_v18, %v494_v46  ;;  %v227_v21 = vpop.f32.mrb[13].mxu0 }
  0xf9   :  { %v228_v22 = vadd.f32 %v494_v46, %v227_v21  ;;  %643 = vmatprep.mubr.f32.mxu1 %v256_v17 }
  0xfa   :  { %644 = vmatmul.mubr.f32.gmra.mrb[4].mxu1 %v257_v19  ;;  %v259_v25 = vmul.f32 2.0, %v233_v20 }
  0xfb   :  { %v258_v23 = vmul.f32 2.0, %v228_v22  ;;  %v595_v24 = vpop.f32.mrb[14].mxu0 }
  0xfc   :  { %v243_v26 = vadd.f32 %v595_v24, %v494_v46  ;;  %v237_v27 = vpop.f32.mrb[15].mxu0 }
  0xfd   :  { %v238_v28 = vadd.f32 %v494_v46, %v237_v27  ;;  %646 = vmatprep.mubr.f32.mxu1 %v258_v23 }
  0xfe   :  { %647 = vmatmul.mubr.f32.gmra.mrb[6].mxu1 %v259_v25  ;;  %v261_v30 = vmul.f32 2.0, %v243_v26 }
  0xff   :  { %v260_v29 = vmul.f32 2.0, %v238_v28 }
 0x101   :  { %649 = vmatprep.mubr.f32.mxu1 %v260_v29 }
 0x102   :  { %650 = vmatmul.mubr.f32.gmra.mrb[8].mxu1 %v261_v30 }
 0x1b9   :  { %v630_v32 = vpop.f32.mrb[16].mxu0 }
 0x1ba   :  { %v389_v33 = vadd.f32 %v630_v32, %v511_v31  ;;  %v383_v34 = vpop.f32.mrb[17].mxu0 }
 0x1bb   :  { %v384_v35 = vadd.f32 %v511_v31, %v383_v34 }
 0x1bc   :  { %463 = vst [vmem:[#allocation3 + $0x8] sm:$0xff] %v389_v33 }
 0x1bd   :  { %462 = vst [vmem:[#allocation3] sm:$0xff] %v384_v35  ;;  %v633_v36 = vpop.f32.mrb[18].mxu0 }
 0x1be   :  { %v399_v37 = vadd.f32 %v633_v36, %v511_v31  ;;  %v393_v38 = vpop.f32.mrb[19].mxu0 }
 0x1bf   :  { %v394_v39 = vadd.f32 %v511_v31, %v393_v38 }
 0x1c0   :  { %465 = vst [vmem:[#allocation3 + $0x18] sm:$0xff] %v399_v37 }
 0x1c1   :  { %464 = vst [vmem:[#allocation3 + $0x10] sm:$0xff] %v394_v39  ;;  %v636_v40 = vpop.f32.mrb[20].mxu0 }
 0x1c2   :  { %v409_v41 = vadd.f32 %v636_v40, %v511_v31  ;;  %v403_v42 = vpop.f32.mrb[21].mxu0 }
 0x1c3   :  { %v404_v43 = vadd.f32 %v511_v31, %v403_v42 }
 0x1c4   :  { %467 = vst [vmem:[#allocation3 + $0x28] sm:$0xff] %v409_v41 }
 0x1c5   :  { %466 = vst [vmem:[#allocation3 + $0x20] sm:$0xff] %v404_v43  ;;  %v639_v44 = vpop.f32.mrb[0].mxu1 }
 0x1c6   :  { %v419_v45 = vadd.f32 %v639_v44, %v511_v31  ;;  %v413_v46 = vpop.f32.mrb[1].mxu1 }
 0x1c7   :  { %v414_v47 = vadd.f32 %v511_v31, %v413_v46 }
 0x1c8   :  { %469 = vst [vmem:[#allocation3 + $0x38] sm:$0xff] %v419_v45 }
 0x1c9   :  { %468 = vst [vmem:[#allocation3 + $0x30] sm:$0xff] %v414_v47  ;;  %v642_v48 = vpop.f32.mrb[2].mxu1 }
 0x1ca   :  { %v429_v49 = vadd.f32 %v642_v48, %v511_v31  ;;  %v423_v50 = vpop.f32.mrb[3].mxu1 }
 0x1cb   :  { %v424_v51 = vadd.f32 %v511_v31, %v423_v50 }
 0x1cc   :  { %471 = vst [vmem:[#allocation3 + $0x48] sm:$0xff] %v429_v49 }
 0x1cd   :  { %470 = vst [vmem:[#allocation3 + $0x40] sm:$0xff] %v424_v51  ;;  %v645_v52 = vpop.f32.mrb[4].mxu1 }
 0x1ce   :  { %v439_v53 = vadd.f32 %v645_v52, %v511_v31  ;;  %v433_v54 = vpop.f32.mrb[5].mxu1 }
 0x1cf   :  { %v434_v55 = vadd.f32 %v511_v31, %v433_v54 }
 0x1d0   :  { %473 = vst [vmem:[#allocation3 + $0x58] sm:$0xff] %v439_v53 }
 0x1d1   :  { %472 = vst [vmem:[#allocation3 + $0x50] sm:$0xff] %v434_v55  ;;  %v648_v56 = vpop.f32.mrb[6].mxu1 }
 0x1d2   :  { %v449_v57 = vadd.f32 %v648_v56, %v511_v31  ;;  %v443_v58 = vpop.f32.mrb[7].mxu1 }
 0x1d3   :  { %v444_v59 = vadd.f32 %v511_v31, %v443_v58 }
 0x1d4   :  { %475 = vst [vmem:[#allocation3 + $0x68] sm:$0xff] %v449_v57 }
 0x1d5   :  { %474 = vst [vmem:[#allocation3 + $0x60] sm:$0xff] %v444_v59  ;;  %v651_v60 = vpop.f32.mrb[8].mxu1 }
 0x1d6   :  { %v459_v61 = vadd.f32 %v651_v60, %v511_v31  ;;  %v453_v62 = vpop.f32.mrb[9].mxu1 }
 0x1d7   :  { %v454_v63 = vadd.f32 %v511_v31, %v453_v62 }
 0x1d8   :  { %477 = vst [vmem:[#allocation3 + $0x78] sm:$0xff] %v459_v61 }
 0x1d9   :  { %476 = vst [vmem:[#allocation3 + $0x70] sm:$0xff] %v454_v63 }
 0x1da   :  { %722 = shalt.err (!%p719_p4)
}
 0x1db   :  { %s723_s17 = scalar_lea.hbm %s915_s5, 2048 }
 0x1dc   :  { %p724_p5 = scmp.ne.s32.totalorder %s915_s5, %s723_s17  ;;  %p727_p6 = scmp.lt.u32.totalorder %s723_s17, %s915_s5 }
 0x1de   :  { %p729_p7 = pnand %p727_p6, %p724_p5 }
 0x1e0   :  { %732 = shalt.err (!%p729_p7)
}
 0x1e1   :  { %s736_s22 = smov 128   ;;  %s737_s23 = smov 8  }
 0x1e2   :  { %489 = dma.vmem_to_hbm [thread:$0]  %s484_s4, 2048, %s915_s5, [#allocation4], %s736_s22, %s736_s22, %s737_s23  }
 0x1e3   :  { %733 = dma.done.wait [#allocation4], 2048  }
 0x1e4   :  { %734 = vsyncadd [#allocation4], 4294965248 }
 0x1e5   :  { %493 = vsyncpa [#allocation4], 1 }

</bundles_post_ra>
